<compile_context>
chip_gen: v7x
topology: tpu7x:2x2x1
jax: 0.10.0
libtpu: 0.0.40
codegen_flags: <defaults>
</compile_context>

<pallas_src>
import jax
import jax.numpy as jnp
from jax.experimental import pallas as pl
from jax.experimental.pallas import tpu as pltpu


def _attention_kernel(enc_ref, hb_ref, mask_ref, we_ref, v_ref, out_ref):
    # enc_ref  : (TS*B, 2E)   flattened (s-major, b-minor) encoder rows
    # hb_ref   : (TS*B, dec)  hidden @ Wh + b, pre-tiled to the block row pattern
    # mask_ref : (TS*B, 1)    int32, 0 = masked
    # we_ref   : (2E, dec)    encoder half of the concat-linear weight (resident)
    # v_ref    : (dec, 1)     score vector (resident)
    # out_ref  : (TS*B, 1)
    ee = jnp.dot(enc_ref[...], we_ref[...],
                 preferred_element_type=jnp.float32)          # (TS*B, dec)  MXU
    energy = jnp.tanh(ee + hb_ref[...])                       # VPU + EUP, f32
    att = jnp.dot(energy, v_ref[...],
                  preferred_element_type=jnp.float32)         # (TS*B, 1)    MXU
    out_ref[...] = jnp.where(mask_ref[...] == 0, jnp.float32(-1e10), att)


def _choose_s_tile(S, B, enc2):
    """Pick an S-tile so each block is big (amortize ~0.35us/step) but VMEM-safe."""
    budget = 8 * 1024 * 1024                      # ~8 MiB enc block (x2 double-buffer)
    if S * B * enc2 * 4 <= budget:
        return S                                  # single / few big blocks
    ts = max(1, budget // (B * enc2 * 4))
    ts = min(ts, S)
    # keep TS*B a multiple of 8 for clean sublane tiling of the flattened rows
    while ts > 1 and (ts * B) % 8 != 0:
        ts -= 1
    if (ts * B) % 8 != 0:
        ts = S
    return ts


def attention_forward(hidden, encoder_outputs, mask, W, b, v):
    """
    hidden          : [B, dec] float32
    encoder_outputs : [S, B, 2*enc] float32
    mask            : [B, S] int (0 = masked out)
    W               : [2*enc + dec, dec]  input-major linear weight (rows 0:dec act
                      on hidden, rows dec: act on encoder outputs — matches
                      torch.cat((hidden, enc), dim=2) @ attn.weight.T)
    b               : [dec]
    v               : [dec]
    returns         : [B, S] float32
    """
    S, B, enc2 = encoder_outputs.shape
    dec = hidden.shape[1]

    Wh = W[:dec, :]                                   # (dec, dec)
    We = W[dec:, :]                                   # (2*enc, dec)

    ts = _choose_s_tile(S, B, enc2)
    n_tiles = pl.cdiv(S, ts)
    tsb = ts * B

    # Free, contiguous flatten — no HBM pass over the big tensor.
    enc_flat = encoder_outputs.reshape(S * B, enc2)   # (S*B, 2E), s-major/b-minor

    # Tiny wrapper-side precompute (removes a padded 1-row matmul per grid step).
    hb = hidden @ Wh + b                              # (B, dec)
    hb_tiled = jnp.tile(hb, (ts, 1))                  # (TS*B, dec), one resident block

    # Only small tensors get transposed in the wrapper.
    mask_flat = mask.astype(jnp.int32).T.reshape(S * B, 1)   # (S*B, 1)
    v2 = v.reshape(dec, 1)

    out = pl.pallas_call(
        _attention_kernel,
        out_shape=jax.ShapeDtypeStruct((S * B, 1), jnp.float32),
        grid_spec=pltpu.PrefetchScalarGridSpec(
            num_scalar_prefetch=0,
            grid=(n_tiles,),
            in_specs=[
                pl.BlockSpec((tsb, enc2), lambda s: (s, 0)),   # encoder rows (native order)
                pl.BlockSpec((tsb, dec), lambda s: (0, 0)),    # hidden@Wh + b (resident)
                pl.BlockSpec((tsb, 1), lambda s: (s, 0)),      # mask
                pl.BlockSpec((enc2, dec), lambda s: (0, 0)),   # We (resident)
                pl.BlockSpec((dec, 1), lambda s: (0, 0)),      # v (resident)
            ],
            out_specs=pl.BlockSpec((tsb, 1), lambda s: (s, 0)),
        ),
        compiler_params=pltpu.CompilerParams(
            dimension_semantics=("parallel",)),
    )(enc_flat, hb_tiled, mask_flat, We, v2)

    # Tiny (S*B) -> (B, S) rearrangement of the small result.
    return out.reshape(S, B).T


def attention_reference(hidden, encoder_outputs, mask, W, b, v):
    S, B, _ = encoder_outputs.shape
    enc = jnp.transpose(encoder_outputs, (1, 0, 2))                  # (B, S, 2E)
    hid = jnp.broadcast_to(hidden[:, None, :], (B, S, hidden.shape[1]))
    cat = jnp.concatenate([hid, enc], axis=2)                        # (B, S, 2E+dec)
    energy = jnp.tanh(cat @ W + b)                                   # (B, S, dec)
    att = jnp.einsum("bsd,d->bs", energy, v)                         # (B, S)
    return jnp.where(mask == 0, -1e10, att)


if __name__ == "__main__":
    enc_hid_dim = 16
    dec_hid_dim = 32
    batch = 2
    src_len = 8

    key = jax.random.PRNGKey(0)
    k1, k2, k3, k4, k5, k6 = jax.random.split(key, 6)

    in_dim = enc_hid_dim * 2 + dec_hid_dim
    W = jax.random.normal(k1, (in_dim, dec_hid_dim), dtype=jnp.float32) * 0.1
    b = jax.random.normal(k2, (dec_hid_dim,), dtype=jnp.float32) * 0.1
    v = jax.random.uniform(k3, (dec_hid_dim,), dtype=jnp.float32)

    hidden = jax.random.normal(k4, (batch, dec_hid_dim), dtype=jnp.float32)
    encoder_outputs = jax.random.normal(
        k5, (src_len, batch, enc_hid_dim * 2), dtype=jnp.float32)
    mask = (jax.random.uniform(k6, (batch, src_len)) > 0.3).astype(jnp.int32)

    out = attention_forward(hidden, encoder_outputs, mask, W, b, v)
    out = jax.block_until_ready(out)

    ref = attention_reference(hidden, encoder_outputs, mask, W, b, v)
    assert out.shape == (batch, src_len)
    assert jnp.allclose(out, ref, atol=1e-4, rtol=1e-4), (out, ref)

    print("KERNEL_OK")
</pallas_src>

<mosaic_0001>
module attributes {stable_mosaic.version = 11 : i64} {
  func.func @_attention_kernel(%arg0: i32, %arg1: memref<16x32xf32, #tpu.memory_space<vmem>>, %arg2: memref<16x32xf32, #tpu.memory_space<vmem>>, %arg3: memref<16x1xi32, #tpu.memory_space<vmem>>, %arg4: memref<32x32xf32, #tpu.memory_space<vmem>>, %arg5: memref<32x1xf32, #tpu.memory_space<vmem>>, %arg6: memref<16x1xf32, #tpu.memory_space<vmem>>) attributes {dimension_semantics = [#tpu.dimension_semantics<parallel>], iteration_bounds = array<i64: 1>, scalar_prefetch = 0 : i64, scratch_operands = 0 : i64, tpu.core_type = #tpu.core_type<tc>, window_params = [{transform_indices = @transform_0, window_bounds = array<i64: 16, 32>}, {pipeline_mode = #tpu.pipeline_mode<synchronous>, transform_indices = @transform_1, window_bounds = array<i64: 16, 32>}, {transform_indices = @transform_2, window_bounds = array<i64: 16, 1>}, {pipeline_mode = #tpu.pipeline_mode<synchronous>, transform_indices = @transform_3, window_bounds = array<i64: 32, 32>}, {pipeline_mode = #tpu.pipeline_mode<synchronous>, transform_indices = @transform_4, window_bounds = array<i64: 32, 1>}, {transform_indices = @transform_5, window_bounds = array<i64: 16, 1>}]} {
    %c0 = arith.constant 0 : index
    %c0_0 = arith.constant 0 : index
    %0 = vector.load %arg1[%c0, %c0_0] : memref<16x32xf32, #tpu.memory_space<vmem>>, vector<16x32xf32>
    %c0_1 = arith.constant 0 : index
    %c0_2 = arith.constant 0 : index
    %1 = vector.load %arg4[%c0_1, %c0_2] : memref<32x32xf32, #tpu.memory_space<vmem>>, vector<32x32xf32>
    %cst = arith.constant dense<0.000000e+00> : vector<16x32xf32>
    %2 = tpu.matmul %0, %1, %cst {dimension_numbers = #tpu.dot_dimension_numbers<[1], [0], [0], [1], [0, 0, 1, 1], [], []>} : vector<16x32xf32>, vector<32x32xf32>, vector<16x32xf32> -> vector<16x32xf32>
    %c0_3 = arith.constant 0 : index
    %c0_4 = arith.constant 0 : index
    %3 = vector.load %arg2[%c0_3, %c0_4] : memref<16x32xf32, #tpu.memory_space<vmem>>, vector<16x32xf32>
    %4 = arith.addf %2, %3 : vector<16x32xf32>
    %5 = math.tanh %4 : vector<16x32xf32>
    %c0_5 = arith.constant 0 : index
    %c0_6 = arith.constant 0 : index
    %6 = vector.load %arg5[%c0_5, %c0_6] : memref<32x1xf32, #tpu.memory_space<vmem>>, vector<32x1xf32>
    %cst_7 = arith.constant dense<0.000000e+00> : vector<16x1xf32>
    %7 = tpu.matmul %5, %6, %cst_7 {dimension_numbers = #tpu.dot_dimension_numbers<[1], [0], [0], [1], [0, 0, 1, 1], [], []>} : vector<16x32xf32>, vector<32x1xf32>, vector<16x1xf32> -> vector<16x1xf32>
    %c0_8 = arith.constant 0 : index
    %c0_9 = arith.constant 0 : index
    %8 = vector.load %arg3[%c0_8, %c0_9] : memref<16x1xi32, #tpu.memory_space<vmem>>, vector<16x1xi32>
    %c0_i32 = arith.constant 0 : i32
    %9 = vector.broadcast %c0_i32 : i32 to vector<16x1xi32>
    %10 = arith.cmpi eq, %8, %9 : vector<16x1xi32>
    %cst_10 = arith.constant -1.000000e+10 : f32
    %11 = vector.broadcast %cst_10 : f32 to vector<16x1xf32>
    %12 = arith.select %10, %11, %7 : vector<16x1xi1>, vector<16x1xf32>
    %c0_11 = arith.constant 0 : index
    %c0_12 = arith.constant 0 : index
    %13 = vector.load %arg6[%c0_11, %c0_12] : memref<16x1xf32, #tpu.memory_space<vmem>>, vector<16x1xf32>
    tpu.vector_store %arg6[%c0_11, %c0_12], %12 {strides = array<i32>} : memref<16x1xf32, #tpu.memory_space<vmem>>, vector<16x1xf32>,
    return
  }
  func.func @transform_0(%arg0: i32) -> (i32, i32) {
    %c0_i32 = arith.constant 0 : i32
    %c0_i32_0 = arith.constant 0 : i32
    return %arg0, %c0_i32 : i32, i32
  }
  func.func @transform_1(%arg0: i32) -> (i32, i32) {
    %c0_i32 = arith.constant 0 : i32
    %c0_i32_0 = arith.constant 0 : i32
    %c0_i32_1 = arith.constant 0 : i32
    return %c0_i32, %c0_i32_0 : i32, i32
  }
  func.func @transform_2(%arg0: i32) -> (i32, i32) {
    %c0_i32 = arith.constant 0 : i32
    %c0_i32_0 = arith.constant 0 : i32
    return %arg0, %c0_i32 : i32, i32
  }
  func.func @transform_3(%arg0: i32) -> (i32, i32) {
    %c0_i32 = arith.constant 0 : i32
    %c0_i32_0 = arith.constant 0 : i32
    %c0_i32_1 = arith.constant 0 : i32
    return %c0_i32, %c0_i32_0 : i32, i32
  }
  func.func @transform_4(%arg0: i32) -> (i32, i32) {
    %c0_i32 = arith.constant 0 : i32
    %c0_i32_0 = arith.constant 0 : i32
    %c0_i32_1 = arith.constant 0 : i32
    return %c0_i32, %c0_i32_0 : i32, i32
  }
  func.func @transform_5(%arg0: i32) -> (i32, i32) {
    %c0_i32 = arith.constant 0 : i32
    %c0_i32_0 = arith.constant 0 : i32
    return %arg0, %c0_i32 : i32, i32
  }
}

</mosaic_0001>

<bundles_post_ra>
// kernel: tpu_custom_call.1
= control target key start
LH: loop header
LB: loop body
LE: loop exit
PB: predicated region body
PF: predicated region fallthrough
CT: control target
= control target key end

     0   :  { %10 = vsyncpa [#allocation3], 0  ;;  %s310_s18 = smov [#allocation2]   ;;  %s401_s0 = inlined_call_operand.vmem [shape: f32[16,32], index: 0, kind: input, shape index: {}]   ;;  %s402_s1 = inlined_call_operand.hbm [shape: f32[16,32], index: 1, kind: input, shape index: {}]   ;;  %s403_s2 = inlined_call_operand.vmem [shape: s32[16,1], index: 2, kind: input, shape index: {}]   ;;  %s404_s3 = inlined_call_operand.vmem [shape: f32[32,32], index: 3, kind: input, shape index: {}]   ;;  %s405_s4 = inlined_call_operand.vmem [shape: f32[32,1], index: 4, kind: input, shape index: {}]   ;;  %s406_s5 = inlined_call_operand.vmem [shape: f32[16,1], index: 5, kind: output, shape index: {}]  }
   0x1   :  { %s18_s19 = sshll.u32 %s310_s18, 4  ;;  %s286_s22 = scalar_lea.hbm %s402_s1, 256  ;;  %s19_s19 = int_to_ptr.vmem [resolvable:$true] %s18_s19 }
   0x2   :  { %p287_p0 = scmp.ne.s32.totalorder %s402_s1, %s286_s22  ;;  %p290_p1 = scmp.lt.u32.totalorder %s286_s22, %s402_s1 }
   0x4   :  { %p292_p2 = pnand %p290_p1, %p287_p0 }
   0x6   :  { %295 = shalt.err (!%p292_p2)
}
   0x7   :  { %s296_s27 = scalar_lea.vmem %s19_s19, 256  ;;  %p301_p4 = scmp.lt.s32.totalorder %s19_s19, %s19_s19 }
   0x8   :  { %p297_p3 = scmp.ne.s32.totalorder %s19_s19, %s296_s27  ;;  %p302_p5 = scmp.lt.s32.totalorder %s296_s27, %s296_s27 }
   0xa   :  { %p303_p6 = por %p302_p5, %p301_p4 }
   0xc   :  { %p304_p7 = pnand %p303_p6, %p297_p3 }
   0xe   :  { %307 = shalt.err (!%p304_p7)
}
   0xf   :  { %s311_s28 = smov 128   ;;  %s312_s29 = smov 8  }
  0x10   :  { %24 = dma.hbm_to_vmem [thread:$0]  %s402_s1, 256, %s19_s19, [#allocation3], %s311_s28, %s311_s28, %s312_s29  }
  0x11   :  { %308 = dma.done.wait [#allocation3], 256  }
  0x12   :  { %309 = vsyncadd [#allocation3], 4294967040  ;;  %vm42_vm0 = vcmask 261120   ;;  %v36_v0 = vld [vmem:[%s404_s3] sm:$0xff]  ;;  %v37_v1 = vld [vmem:[%s404_s3 + $0x8] sm:$0xff]  ;;  %vm217_vm2 = vcmask 7168  }
  0x13   :  { %v38_v2 = vld [vmem:[%s404_s3 + $0x10] sm:$0xff]  ;;  %v263_v3 = vpack.c.bf16 %v37_v1, %v36_v0  ;;  %v39_v4 = vld [vmem:[%s404_s3 + $0x18] sm:$0xff]  ;;  %v34_v5 = vld [vmem:[%s401_s0] sm:$0xff] }
  0x14   :  { %v267_v6 = vpack.c.bf16 %v39_v4, %v38_v2  ;;  %249 = vmatprep.mubr.msk.f32.mxu0 %vm42_vm0, %v34_v5  ;;  %v35_v7 = vld [vmem:[%s401_s0 + $0x8] sm:$0xff]  ;;  %v126_v8 = vld [vmem:[%s405_s4] sm:$0xff]  ;;  %v128_v10 = vld [vmem:[%s405_s4 + $0x10] sm:$0xff] }
  0x15   :  { %264 = vmatprep.subr.bf16.mxu0 %v263_v3  ;;  %v127_v9 = vld [vmem:[%s405_s4 + $0x8] sm:$0xff]  ;;  %v129_v12 = vld [vmem:[%s405_s4 + $0x18] sm:$0xff]  ;;  %v40_v15 = vld [vmem:[#allocation2] sm:$0xff] }
  0x16   :  { %266 = vmatpush3.bf16.msra.mxu0 %v263_v3  ;;  %v271_v11 = vpack.c.bf16 %v127_v9, %v126_v8  ;;  %v275_v13 = vpack.c.bf16 %v129_v12, %v128_v10  ;;  %v41_v14 = vld [vmem:[#allocation2 + $0x8] sm:$0xff]  ;;  %v211_v23 = vld [vmem:[%s403_s2] sm:$0xff] }
  0x17   :  { %268 = vmatprep.subr.bf16.mxu0 %v267_v6  ;;  %v212_v22 = vld [vmem:[%s403_s2 + $0x8] sm:$0xff]  ;;  %vm213_vm3 = vcmp.eq.s32.totalorder %v211_v23, 0 }
  0x18   :  { %272 = vmatprep.subr.bf16.mxu1 %v271_v11  ;;  %vm214_vm1 = vcmp.eq.s32.totalorder %v212_v22, 0 }
  0x19   :  { %274 = vmatpush3.bf16.msra.mxu1 %v271_v11 }
  0x1a   :  { %270 = vmatpush3.bf16.msra.mxu0 %v267_v6  ;;  %276 = vmatprep.subr.bf16.mxu1 %v275_v13 }
  0x1d   :  { %250 = vmatmul.mubr.msk.f32.vlgmr.msra.gmra.mrb[0].mxu0 %vm42_vm0, %v35_v7  ;;  %278 = vmatpush3.bf16.msra.mxu1 %v275_v13 }
  0xf0   :  { %v251_v16 = vpop.f32.mrb[0].mxu0 }
  0xf1   :  { %v121_v17 = vadd.f32 %v251_v16, %v41_v14  ;;  %v115_v18 = vpop.f32.mrb[1].mxu0 }
  0xf2   :  { %v116_v19 = vadd.f32 %v115_v18, %v40_v15 }
  0xf4   :  { %282 = vtanh.f32 %v116_v19 }
  0xf5   :  { %284 = vtanh.f32 %v121_v17 }
  0xfe   :  { %v283_v20 = vpop.eup %282 }
  0xff   :  { %v285_v21 = vpop.eup %284  ;;  %260 = vmatprep.mubr.msk.f32.mxu1 %vm42_vm0, %v283_v20 }
 0x100   :  { %261 = vmatmul.mubr.msk.f32.vlgmr.msra.gmra.mrb[0].mxu1 %vm42_vm0, %v285_v21 }
 0x1d3   :  { %v262_v24 = vpop.f32.mrb[0].mxu1 }
 0x1d4   :  { %v216_v25 = vsel %vm214_vm1, -1e+10, %v262_v24  ;;  %v202_v26 = vpop.f32.mrb[1].mxu1 }
 0x1d5   :  { %219 = vst.msk [vmem:[%s406_s5 + $0x8] sm:$0xff] %vm217_vm2, %v216_v25  ;;  %v215_v27 = vsel %vm213_vm3, -1e+10, %v202_v26 }
 0x1d6   :  { %218 = vst.msk [vmem:[%s406_s5] sm:$0xff] %vm217_vm2, %v215_v27 }
 0x1d7   :  { %224 = vsyncpa [#allocation3], 1 }

</bundles_post_ra>
